<compile_context>
chip_gen: v5e
topology: v5e:2x2
jax: 0.10.0
libtpu: 0.0.40
codegen_flags: <defaults>
</compile_context>

<pallas_src>
import functools

import numpy as np

import jax
import jax.numpy as jnp
from jax.experimental import pallas as pl
from jax.experimental.pallas import tpu as pltpu


def resblock_kernel(x_ref, bab_ref, bc_ref, pab_ref, pc2_ref, out_ref, *, img_h):
    """Fused ResBlock forward, batch folded into rows, lane-dense layout.

    x_ref:   (N*H, W*Cin)          input rows (w-major, ci-minor on lanes), f32
    bab_ref: (3*W*Cin, 2*W*Cout)   fused conv_a|conv_b banded weights, dy taps
                                   stacked along K, BN_a/BN_b scales folded into
                                   the output columns, bf16
    bc_ref:  (3*W*Cout, W*Cout)    conv_c banded weights, BN1 scale folded, bf16
    pab_ref: (1, 2*W*Cout)         folded BN_a|BN_b shift row, f32
    pc2_ref: (3, W*Cout)           rows = [shift_BN1, scale_BN2, shift_BN2], f32
    out_ref: (N*H, W*Cout)         f32
    """
    x = x_ref[...]                        # (NH, W*Cin) f32
    nh = x.shape[0]
    wc_out = out_ref.shape[1]

    # Per-image vertical-boundary masks.  The batch is folded into the row
    # axis, so the dy = -1/+1 taps must be zeroed at each image's top/bottom
    # rows (otherwise rows leak between adjacent batch elements).
    row = jax.lax.broadcasted_iota(jnp.int32, (nh, 1), 0)
    not_top = (row % img_h) != 0                 # dy = -1 tap valid
    not_bot = (row % img_h) != (img_h - 1)       # dy = +1 tap valid

    def dy_taps(a):
        # (NH, C) -> (NH, 3*C): lane-concatenated [row-1 | row | row+1] with the
        # shifted taps zeroed at image boundaries.  Static row shifts; the lane
        # concat happens at 128-lane multiples.  (pltpu.roll(a, +/-1, axis=0)
        # is the XLU alternative if H grows large.)
        z = jnp.zeros((1, a.shape[1]), jnp.float32)
        a_m1 = jnp.where(not_top, jnp.concatenate([z, a[:-1, :]], axis=0), 0.0)
        a_p1 = jnp.where(not_bot, jnp.concatenate([a[1:, :], z], axis=0), 0.0)
        return jnp.concatenate([a_m1, a, a_p1], axis=1)

    # Fused conv_a | conv_b as a single bf16 MXU matmul with K = 3*W*Cin.
    # BN scales are folded into the weight columns, so only shift + ReLU remain.
    lhs_x = dy_taps(x).astype(jnp.bfloat16)                      # (NH, 3*W*Cin)
    y = jnp.dot(lhs_x, bab_ref[...], preferred_element_type=jnp.float32)
    y = jnp.maximum(y + pab_ref[0:1, :], 0.0)                    # (NH, 2*W*Cout)
    x1 = y[:, :wc_out]            # ReLU(BN_a(conv_a(x)))
    t = y[:, wc_out:]             # ReLU(BN_b(conv_b(x)))

    # conv_c on t: one more bf16 matmul with K = 3*W*Cout; BN1 scale folded in.
    lhs_t = dy_taps(t).astype(jnp.bfloat16)                      # (NH, 3*W*Cout)
    x2 = jnp.dot(lhs_t, bc_ref[...], preferred_element_type=jnp.float32)
    x2 = x2 + pc2_ref[0:1, :]                                    # BN1 shift

    # out = ReLU(BN2(x_1 + x_2)).
    # NOTE: matches PyTorch — `residual` is computed but never added there,
    # so it is intentionally omitted here as well.
    out = jnp.maximum((x1 + x2) * pc2_ref[1:2, :] + pc2_ref[2:3, :], 0.0)
    out_ref[...] = out.astype(out_ref.dtype)


def build_banded(w_hwio, w_spatial):
    """3x3 'SAME' conv as 3 banded matrices (one per dy tap).

    Returns B of shape (3, W*Cin, W*Cout) with
      B[dy, wi*Cin + ci, wo*Cout + co] = w[dy, wi - wo + 1, ci, co]
    for wi - wo in {-1, 0, 1} and 0 <= wi < W, zero elsewhere
    (so width zero-padding is implicit in the band structure).
    """
    w = np.asarray(w_hwio, dtype=np.float32)
    kh, kw, cin, cout = w.shape
    B = np.zeros((kh, w_spatial * cin, w_spatial * cout), np.float32)
    for dy in range(kh):
        for dx in range(kw):
            for wo in range(w_spatial):
                wi = wo + dx - 1
                if 0 <= wi < w_spatial:
                    B[dy, wi * cin:(wi + 1) * cin,
                      wo * cout:(wo + 1) * cout] = w[dy, dx]
    return jnp.asarray(B)


def resblock_forward(x_nhwc, wa, wb, wc, pvec):
    """x_nhwc: (N, H, W, Cin) float32. Returns (N, H, W, Cout)."""
    N, H, W, Cin = x_nhwc.shape
    Cout = wa.shape[-1]
    wc_in, wc_out = W * Cin, W * Cout
    NH = N * H

    sa, sha, sb, shb, sc, shc, s2, sh2 = [pvec[i] for i in range(8)]

    def tile_row(v):                       # (Cout,) -> (W*Cout,), lane layout wo*Cout+co
        return jnp.tile(v, W)

    # --- one-time weight / BN prep (wrapper glue) ---
    # Banded weights: dy taps stacked along K -> one matmul per conv.  BN scales
    # (gamma / sqrt(var+eps)) are folded into the output columns; then cast to
    # bf16 for the MXU (f32 accumulation happens in-kernel).
    bab = jnp.concatenate([build_banded(wa, W), build_banded(wb, W)], axis=2)   # (3, wc_in, 2*wc_out)
    bab = bab * jnp.concatenate([tile_row(sa), tile_row(sb)])[None, None, :]
    bab = bab.reshape(3 * wc_in, 2 * wc_out).astype(jnp.bfloat16)               # (3*wc_in, 2*wc_out)

    bcm = build_banded(wc, W) * tile_row(sc)[None, None, :]                     # (3, wc_out, wc_out)
    bcm = bcm.reshape(3 * wc_out, wc_out).astype(jnp.bfloat16)                  # (3*wc_out, wc_out)

    # Remaining per-channel rows: shift_a|shift_b (fused), shift_BN1, scale/shift_BN2.
    pab = jnp.concatenate([tile_row(sha), tile_row(shb)])[None, :]              # (1, 2*wc_out)
    pc2 = jnp.stack([tile_row(shc), tile_row(s2), tile_row(sh2)], axis=0)       # (3, wc_out)

    # Batch folded into the matmul M dimension: lane-dense (N*H, W*Cin) rows.
    x_rows = x_nhwc.reshape(NH, wc_in)

    flops = 2 * NH * (3 * wc_in) * (2 * wc_out) + 2 * NH * (3 * wc_out) * wc_out
    bytes_accessed = (NH * wc_in * 4                 # x
                      + 3 * wc_in * 2 * wc_out * 2   # bab (bf16)
                      + 3 * wc_out * wc_out * 2      # bc  (bf16)
                      + 2 * wc_out * 4 + 3 * wc_out * 4
                      + NH * wc_out * 4)             # out

    out_rows = pl.pallas_call(
        functools.partial(resblock_kernel, img_h=H),
        out_shape=jax.ShapeDtypeStruct((NH, wc_out), jnp.float32),
        grid_spec=pltpu.PrefetchScalarGridSpec(
            num_scalar_prefetch=0,
            # Single grid step (batch lives in M): no serial grid overhead on
            # single-TC v5e/v6e, and no weight duplication across TCs at N=2.
            # For large N on v7x, chunk N here with dimension_semantics=("parallel",).
            grid=(1,),
            in_specs=[
                pl.BlockSpec((NH, wc_in), lambda i: (0, 0)),
                pl.BlockSpec((3 * wc_in, 2 * wc_out), lambda i: (0, 0)),
                pl.BlockSpec((3 * wc_out, wc_out), lambda i: (0, 0)),
                pl.BlockSpec((1, 2 * wc_out), lambda i: (0, 0)),
                pl.BlockSpec((3, wc_out), lambda i: (0, 0)),
            ],
            out_specs=pl.BlockSpec((NH, wc_out), lambda i: (0, 0)),
        ),
        compiler_params=pltpu.CompilerParams(
            dimension_semantics=("arbitrary",)),
        cost_estimate=pl.CostEstimate(flops=flops, transcendentals=0,
                                      bytes_accessed=bytes_accessed),
    )(x_rows, bab, bcm, pab, pc2)

    return out_rows.reshape(N, H, W, Cout)


def fold_bn(gamma, beta, mean, var, conv_bias=None, eps=1e-5):
    scale = gamma / jnp.sqrt(var + eps)
    shift = beta - mean * scale
    if conv_bias is not None:
        shift = shift + scale * conv_bias
    return scale, shift


def make_params(key, cin, cout):
    """Deterministic synthetic ResBlock parameters (HWIO conv weights)."""
    ks = jax.random.split(key, 10)
    wa = jax.random.normal(ks[0], (3, 3, cin, cout), jnp.float32) * 0.1
    wb = jax.random.normal(ks[1], (3, 3, cin, cout), jnp.float32) * 0.1
    wc = jax.random.normal(ks[2], (3, 3, cout, cout), jnp.float32) * 0.1
    ba_ = jax.random.normal(ks[3], (cout,), jnp.float32) * 0.1
    bb_ = jax.random.normal(ks[4], (cout,), jnp.float32) * 0.1
    bc_ = jax.random.normal(ks[5], (cout,), jnp.float32) * 0.1

    def bn_params(k):
        k1, k2, k3, k4 = jax.random.split(k, 4)
        gamma = 1.0 + 0.1 * jax.random.normal(k1, (cout,), jnp.float32)
        beta = 0.1 * jax.random.normal(k2, (cout,), jnp.float32)
        mean = 0.1 * jax.random.normal(k3, (cout,), jnp.float32)
        var = jax.random.uniform(k4, (cout,), jnp.float32, 0.5, 1.5)
        return gamma, beta, mean, var

    # conv1.bn (BN_a), conv2.bn (BN_b), bn1, bn2
    sa, sha = fold_bn(*bn_params(ks[6]), conv_bias=ba_)
    sb, shb = fold_bn(*bn_params(ks[7]), conv_bias=bb_)
    sc, shc = fold_bn(*bn_params(ks[8]), conv_bias=bc_)
    s2, sh2 = fold_bn(*bn_params(ks[9]), conv_bias=None)

    pvec = jnp.stack([sa, sha, sb, shb, sc, shc, s2, sh2], axis=0)  # (8, cout)
    return wa, wb, wc, pvec


def resblock_reference(x_nhwc, wa, wb, wc, pvec):
    """Pure-JAX f32 reference (lax conv) with the same folded-BN parameterization."""
    def conv(x, w):
        return jax.lax.conv_general_dilated(
            x, w, window_strides=(1, 1), padding=((1, 1), (1, 1)),
            dimension_numbers=("NHWC", "HWIO", "NHWC"))

    sa, ba = pvec[0], pvec[1]
    sb, bb = pvec[2], pvec[3]
    sc, bc = pvec[4], pvec[5]
    s2, b2 = pvec[6], pvec[7]
    x1 = jax.nn.relu(conv(x_nhwc, wa) * sa + ba)
    t = jax.nn.relu(conv(x_nhwc, wb) * sb + bb)
    x2 = conv(t, wc) * sc + bc
    return jax.nn.relu((x1 + x2) * s2 + b2)


if __name__ == "__main__":
    key = jax.random.PRNGKey(0)
    kx, kp = jax.random.split(key)

    N, Cin, Cout, H, W = 2, 8, 8, 16, 16   # matches ResBlock(8, 8) usage in srescnn
    # PyTorch-style NCHW input, transposed to the kernel's NHWC layout.
    x_nchw = jax.random.normal(kx, (N, Cin, H, W), jnp.float32)
    x_nhwc = jnp.transpose(x_nchw, (0, 2, 3, 1))

    wa, wb, wc, pvec = make_params(kp, Cin, Cout)

    out = resblock_forward(x_nhwc, wa, wb, wc, pvec)
    out = jax.block_until_ready(out)

    ref = resblock_reference(x_nhwc, wa, wb, wc, pvec)
    assert out.shape == (N, H, W, Cout)
    # bf16 MXU operands with f32 accumulation vs. f32 reference: tolerance ~2e-2.
    assert jnp.allclose(out, ref, rtol=2e-2, atol=2e-2), "mismatch vs reference"

    print("KERNEL_OK")
</pallas_src>

<mosaic_0001>
module attributes {stable_mosaic.version = 11 : i64} {
  func.func @resblock_kernel(%arg0: i32, %arg1: memref<32x128xf32, #tpu.memory_space<vmem>>, %arg2: memref<384x256xbf16, #tpu.memory_space<vmem>>, %arg3: memref<384x128xbf16, #tpu.memory_space<vmem>>, %arg4: memref<1x256xf32, #tpu.memory_space<vmem>>, %arg5: memref<3x128xf32, #tpu.memory_space<vmem>>, %arg6: memref<32x128xf32, #tpu.memory_space<vmem>>) attributes {dimension_semantics = [#tpu.dimension_semantics<arbitrary>], iteration_bounds = array<i64: 1>, scalar_prefetch = 0 : i64, scratch_operands = 0 : i64, tpu.core_type = #tpu.core_type<tc>, window_params = [{pipeline_mode = #tpu.pipeline_mode<synchronous>, transform_indices = @transform_0, window_bounds = array<i64: 32, 128>}, {pipeline_mode = #tpu.pipeline_mode<synchronous>, transform_indices = @transform_1, window_bounds = array<i64: 384, 256>}, {pipeline_mode = #tpu.pipeline_mode<synchronous>, transform_indices = @transform_2, window_bounds = array<i64: 384, 128>}, {pipeline_mode = #tpu.pipeline_mode<synchronous>, transform_indices = @transform_3, window_bounds = array<i64: 1, 256>}, {pipeline_mode = #tpu.pipeline_mode<synchronous>, transform_indices = @transform_4, window_bounds = array<i64: 3, 128>}, {pipeline_mode = #tpu.pipeline_mode<synchronous>, transform_indices = @transform_5, window_bounds = array<i64: 32, 128>}]} {
    %c0 = arith.constant 0 : index
    %c0_0 = arith.constant 0 : index
    %0 = vector.load %arg1[%c0, %c0_0] : memref<32x128xf32, #tpu.memory_space<vmem>>, vector<32x128xf32>
    %1 = tpu.iota {dimensions = array<i32: 0>} : vector<32x1xi32>
    %c16_i32 = arith.constant 16 : i32
    %c0_i32 = arith.constant 0 : i32
    %2 = arith.cmpi eq, %c16_i32, %c0_i32 : i32
    %c1_i32 = arith.constant 1 : i32
    %3 = arith.select %2, %c1_i32, %c16_i32 : i32
    %4 = vector.broadcast %3 : i32 to vector<32x1xi32>
    %5 = arith.remsi %1, %4 : vector<32x1xi32>
    %c0_i32_1 = arith.constant 0 : i32
    %6 = vector.broadcast %c0_i32_1 : i32 to vector<32x1xi32>
    %7 = arith.cmpi ne, %5, %6 : vector<32x1xi32>
    %c0_i32_2 = arith.constant 0 : i32
    %8 = vector.broadcast %c0_i32_2 : i32 to vector<32x1xi32>
    %9 = arith.cmpi slt, %5, %8 : vector<32x1xi32>
    %c0_i32_3 = arith.constant 0 : i32
    %10 = arith.cmpi slt, %3, %c0_i32_3 : i32
    %11 = vector.broadcast %10 : i1 to vector<32x1xi1>
    %12 = vector.broadcast %11 : vector<32x1xi1> to vector<32x1xi1>
    %13 = arith.xori %9, %12 : vector<32x1xi1>
    %14 = arith.andi %13, %7 : vector<32x1xi1>
    %15 = vector.broadcast %3 : i32 to vector<32x1xi32>
    %16 = arith.addi %5, %15 : vector<32x1xi32>
    %17 = arith.select %14, %16, %5 : vector<32x1xi1>, vector<32x1xi32>
    %c0_i32_4 = arith.constant 0 : i32
    %18 = vector.broadcast %c0_i32_4 : i32 to vector<32x1xi32>
    %19 = arith.cmpi ne, %17, %18 : vector<32x1xi32>
    %c16_i32_5 = arith.constant 16 : i32
    %c0_i32_6 = arith.constant 0 : i32
    %20 = arith.cmpi eq, %c16_i32_5, %c0_i32_6 : i32
    %c1_i32_7 = arith.constant 1 : i32
    %21 = arith.select %20, %c1_i32_7, %c16_i32_5 : i32
    %22 = vector.broadcast %21 : i32 to vector<32x1xi32>
    %23 = arith.remsi %1, %22 : vector<32x1xi32>
    %c0_i32_8 = arith.constant 0 : i32
    %24 = vector.broadcast %c0_i32_8 : i32 to vector<32x1xi32>
    %25 = arith.cmpi ne, %23, %24 : vector<32x1xi32>
    %c0_i32_9 = arith.constant 0 : i32
    %26 = vector.broadcast %c0_i32_9 : i32 to vector<32x1xi32>
    %27 = arith.cmpi slt, %23, %26 : vector<32x1xi32>
    %c0_i32_10 = arith.constant 0 : i32
    %28 = arith.cmpi slt, %21, %c0_i32_10 : i32
    %29 = vector.broadcast %28 : i1 to vector<32x1xi1>
    %30 = vector.broadcast %29 : vector<32x1xi1> to vector<32x1xi1>
    %31 = arith.xori %27, %30 : vector<32x1xi1>
    %32 = arith.andi %31, %25 : vector<32x1xi1>
    %33 = vector.broadcast %21 : i32 to vector<32x1xi32>
    %34 = arith.addi %23, %33 : vector<32x1xi32>
    %35 = arith.select %32, %34, %23 : vector<32x1xi1>, vector<32x1xi32>
    %c15_i32 = arith.constant 15 : i32
    %36 = vector.broadcast %c15_i32 : i32 to vector<32x1xi32>
    %37 = arith.cmpi ne, %35, %36 : vector<32x1xi32>
    %cst = arith.constant 0.000000e+00 : f32
    %38 = vector.broadcast %cst : f32 to vector<1x128xf32>
    %39 = vector.extract_strided_slice %0 {offsets = [0, 0], sizes = [31, 128], strides = [1, 1]} : vector<32x128xf32> to vector<31x128xf32>
    %40 = tpu.concatenate %38, %39 in 0 : vector<1x128xf32>, vector<31x128xf32> -> vector<32x128xf32>
    %cst_11 = arith.constant 0.000000e+00 : f32
    %41 = vector.shape_cast %19 : vector<32x1xi1> to vector<32x1xi1>
    %42 = vector.broadcast %41 : vector<32x1xi1> to vector<32x128xi1>
    %43 = vector.broadcast %cst_11 : f32 to vector<32x128xf32>
    %44 = arith.select %42, %40, %43 : vector<32x128xi1>, vector<32x128xf32>
    %45 = vector.extract_strided_slice %0 {offsets = [1, 0], sizes = [31, 128], strides = [1, 1]} : vector<32x128xf32> to vector<31x128xf32>
    %46 = tpu.concatenate %45, %38 in 0 : vector<31x128xf32>, vector<1x128xf32> -> vector<32x128xf32>
    %cst_12 = arith.constant 0.000000e+00 : f32
    %47 = vector.shape_cast %37 : vector<32x1xi1> to vector<32x1xi1>
    %48 = vector.broadcast %47 : vector<32x1xi1> to vector<32x128xi1>
    %49 = vector.broadcast %cst_12 : f32 to vector<32x128xf32>
    %50 = arith.select %48, %46, %49 : vector<32x128xi1>, vector<32x128xf32>
    %51 = tpu.concatenate %44, %0, %50 in 1 : vector<32x128xf32>, vector<32x128xf32>, vector<32x128xf32> -> vector<32x384xf32>
    %52 = arith.truncf %51 : vector<32x384xf32> to vector<32x384xbf16>
    %c0_13 = arith.constant 0 : index
    %c0_14 = arith.constant 0 : index
    %53 = vector.load %arg2[%c0_13, %c0_14] : memref<384x256xbf16, #tpu.memory_space<vmem>>, vector<384x256xbf16>
    %cst_15 = arith.constant dense<0.000000e+00> : vector<32x256xf32>
    %54 = tpu.matmul %52, %53, %cst_15 {dimension_numbers = #tpu.dot_dimension_numbers<[1], [0], [0], [1], [0, 0, 1, 1], [], []>} : vector<32x384xbf16>, vector<384x256xbf16>, vector<32x256xf32> -> vector<32x256xf32>
    %c0_16 = arith.constant 0 : index
    %c0_17 = arith.constant 0 : index
    %55 = vector.load %arg4[%c0_16, %c0_17] : memref<1x256xf32, #tpu.memory_space<vmem>>, vector<1x256xf32>
    %56 = vector.broadcast %55 : vector<1x256xf32> to vector<32x256xf32>
    %57 = arith.addf %54, %56 : vector<32x256xf32>
    %cst_18 = arith.constant 0.000000e+00 : f32
    %58 = vector.broadcast %cst_18 : f32 to vector<32x256xf32>
    %59 = arith.maximumf %57, %58 : vector<32x256xf32>
    %60 = vector.extract_strided_slice %59 {offsets = [0, 0], sizes = [32, 128], strides = [1, 1]} : vector<32x256xf32> to vector<32x128xf32>
    %61 = vector.extract_strided_slice %59 {offsets = [0, 128], sizes = [32, 128], strides = [1, 1]} : vector<32x256xf32> to vector<32x128xf32>
    %cst_19 = arith.constant 0.000000e+00 : f32
    %62 = vector.broadcast %cst_19 : f32 to vector<1x128xf32>
    %63 = vector.extract_strided_slice %61 {offsets = [0, 0], sizes = [31, 128], strides = [1, 1]} : vector<32x128xf32> to vector<31x128xf32>
    %64 = tpu.concatenate %62, %63 in 0 : vector<1x128xf32>, vector<31x128xf32> -> vector<32x128xf32>
    %cst_20 = arith.constant 0.000000e+00 : f32
    %65 = vector.shape_cast %19 : vector<32x1xi1> to vector<32x1xi1>
    %66 = vector.broadcast %65 : vector<32x1xi1> to vector<32x128xi1>
    %67 = vector.broadcast %cst_20 : f32 to vector<32x128xf32>
    %68 = arith.select %66, %64, %67 : vector<32x128xi1>, vector<32x128xf32>
    %69 = vector.extract_strided_slice %61 {offsets = [1, 0], sizes = [31, 128], strides = [1, 1]} : vector<32x128xf32> to vector<31x128xf32>
    %70 = tpu.concatenate %69, %62 in 0 : vector<31x128xf32>, vector<1x128xf32> -> vector<32x128xf32>
    %cst_21 = arith.constant 0.000000e+00 : f32
    %71 = vector.shape_cast %37 : vector<32x1xi1> to vector<32x1xi1>
    %72 = vector.broadcast %71 : vector<32x1xi1> to vector<32x128xi1>
    %73 = vector.broadcast %cst_21 : f32 to vector<32x128xf32>
    %74 = arith.select %72, %70, %73 : vector<32x128xi1>, vector<32x128xf32>
    %75 = tpu.concatenate %68, %61, %74 in 1 : vector<32x128xf32>, vector<32x128xf32>, vector<32x128xf32> -> vector<32x384xf32>
    %76 = arith.truncf %75 : vector<32x384xf32> to vector<32x384xbf16>
    %c0_22 = arith.constant 0 : index
    %c0_23 = arith.constant 0 : index
    %77 = vector.load %arg3[%c0_22, %c0_23] : memref<384x128xbf16, #tpu.memory_space<vmem>>, vector<384x128xbf16>
    %cst_24 = arith.constant dense<0.000000e+00> : vector<32x128xf32>
    %78 = tpu.matmul %76, %77, %cst_24 {dimension_numbers = #tpu.dot_dimension_numbers<[1], [0], [0], [1], [0, 0, 1, 1], [], []>} : vector<32x384xbf16>, vector<384x128xbf16>, vector<32x128xf32> -> vector<32x128xf32>
    %c0_25 = arith.constant 0 : index
    %c0_26 = arith.constant 0 : index
    %79 = vector.load %arg5[%c0_25, %c0_26] : memref<3x128xf32, #tpu.memory_space<vmem>>, vector<1x128xf32>
    %80 = vector.broadcast %79 : vector<1x128xf32> to vector<32x128xf32>
    %81 = arith.addf %78, %80 : vector<32x128xf32>
    %82 = arith.addf %60, %81 : vector<32x128xf32>
    %c1 = arith.constant 1 : index
    %c0_27 = arith.constant 0 : index
    %83 = vector.load %arg5[%c1, %c0_27] : memref<3x128xf32, #tpu.memory_space<vmem>>, vector<1x128xf32>
    %84 = vector.broadcast %83 : vector<1x128xf32> to vector<32x128xf32>
    %85 = arith.mulf %82, %84 : vector<32x128xf32>
    %c2 = arith.constant 2 : index
    %c0_28 = arith.constant 0 : index
    %86 = vector.load %arg5[%c2, %c0_28] : memref<3x128xf32, #tpu.memory_space<vmem>>, vector<1x128xf32>
    %87 = vector.broadcast %86 : vector<1x128xf32> to vector<32x128xf32>
    %88 = arith.addf %85, %87 : vector<32x128xf32>
    %cst_29 = arith.constant 0.000000e+00 : f32
    %89 = vector.broadcast %cst_29 : f32 to vector<32x128xf32>
    %90 = arith.maximumf %88, %89 : vector<32x128xf32>
    %c0_30 = arith.constant 0 : index
    %c0_31 = arith.constant 0 : index
    %91 = vector.load %arg6[%c0_30, %c0_31] : memref<32x128xf32, #tpu.memory_space<vmem>>, vector<32x128xf32>
    tpu.vector_store %arg6[%c0_30, %c0_31], %90 {strides = array<i32>} : memref<32x128xf32, #tpu.memory_space<vmem>>, vector<32x128xf32>,
    return
  }
  func.func @transform_0(%arg0: i32) -> (i32, i32) {
    %c0_i32 = arith.constant 0 : i32
    %c0_i32_0 = arith.constant 0 : i32
    %c0_i32_1 = arith.constant 0 : i32
    return %c0_i32, %c0_i32_0 : i32, i32
  }
  func.func @transform_1(%arg0: i32) -> (i32, i32) {
    %c0_i32 = arith.constant 0 : i32
    %c0_i32_0 = arith.constant 0 : i32
    %c0_i32_1 = arith.constant 0 : i32
    return %c0_i32, %c0_i32_0 : i32, i32
  }
  func.func @transform_2(%arg0: i32) -> (i32, i32) {
    %c0_i32 = arith.constant 0 : i32
    %c0_i32_0 = arith.constant 0 : i32
    %c0_i32_1 = arith.constant 0 : i32
    return %c0_i32, %c0_i32_0 : i32, i32
  }
  func.func @transform_3(%arg0: i32) -> (i32, i32) {
    %c0_i32 = arith.constant 0 : i32
    %c0_i32_0 = arith.constant 0 : i32
    %c0_i32_1 = arith.constant 0 : i32
    return %c0_i32, %c0_i32_0 : i32, i32
  }
  func.func @transform_4(%arg0: i32) -> (i32, i32) {
    %c0_i32 = arith.constant 0 : i32
    %c0_i32_0 = arith.constant 0 : i32
    %c0_i32_1 = arith.constant 0 : i32
    return %c0_i32, %c0_i32_0 : i32, i32
  }
  func.func @transform_5(%arg0: i32) -> (i32, i32) {
    %c0_i32 = arith.constant 0 : i32
    %c0_i32_0 = arith.constant 0 : i32
    %c0_i32_1 = arith.constant 0 : i32
    return %c0_i32, %c0_i32_0 : i32, i32
  }
}

</mosaic_0001>

<bundles_post_ra>
// kernel: tpu_custom_call.1
= control target key start
LH: loop header
LB: loop body
LE: loop exit
PB: predicated region body
PF: predicated region fallthrough
CT: control target
= control target key end

     0   :  { %10 = vsyncpa [#allocation3], 0  ;;  %s1693_s0 = inlined_call_operand.hbm [shape: f32[32,128], index: 0, kind: input, shape index: {}]   ;;  %s1694_s1 = inlined_call_operand.hbm [shape: bf16[384,256], index: 1, kind: input, shape index: {}]   ;;  %s1695_s2 = inlined_call_operand.hbm [shape: bf16[384,128], index: 2, kind: input, shape index: {}]   ;;  %s1696_s3 = inlined_call_operand.vmem [shape: f32[1,256], index: 3, kind: input, shape index: {}]   ;;  %s1697_s4 = inlined_call_operand.hbm [shape: f32[3,128], index: 4, kind: input, shape index: {}]   ;;  %s1698_s5 = inlined_call_operand.hbm [shape: f32[32,128], index: 5, kind: output, shape index: {}]  }
   0x1   :  { %11 = vsyncpa [#allocation6], 0 }
   0x2   :  { %12 = vsyncpa [#allocation9], 0 }
   0x3   :  { %13 = vsyncpa [#allocation4], 0  ;;  %s31_s20 = sshll.u32 %s1694_s1, 4  ;;  %s1506_s21 = smov [#allocation5]   ;;  %s32_s20 = int_to_ptr.hbm [resolvable:$true] %s31_s20 }
   0x4   :  { %s33_s22 = sshll.u32 %s1506_s21, 4  ;;  %s18_s25 = sshll.u32 %s1693_s0, 4  ;;  %s34_s22 = int_to_ptr.vmem [resolvable:$true] %s33_s22  ;;  %s19_s25 = int_to_ptr.hbm [resolvable:$true] %s18_s25 }
   0x5   :  { %s1507_s26 = smov 128   ;;  %s1508_s27 = smov 8  }
   0x6   :  { %39 = dma.hbm_to_vmem [thread:$0]  %s32_s20, 6144, %s34_s22, [#allocation6], %s1507_s26, %s1507_s26, %s1508_s27  }
   0x7   :  { %s1509_s28 = smov [#allocation2]   ;;  %s44_s1 = sshll.u32 %s1695_s2, 4  ;;  %s45_s1 = int_to_ptr.hbm [resolvable:$true] %s44_s1 }
   0x8   :  { %s20_s29 = sshll.u32 %s1509_s28, 4  ;;  %s1510_s0 = smov [#allocation7]   ;;  %s21_s29 = int_to_ptr.vmem [resolvable:$true] %s20_s29 }
   0x9   :  { %26 = dma.hbm_to_vmem [thread:$0]  %s19_s25, 512, %s21_s29, [#allocation3], %s1507_s26, %s1507_s26, %s1508_s27  }
   0xa   :  { %s46_s7 = sshll.u32 %s1510_s0, 4  ;;  %s60_s10 = sshll.u32 %s1697_s4, 4  ;;  %s47_s7 = int_to_ptr.vmem [resolvable:$true] %s46_s7  ;;  %s61_s10 = int_to_ptr.hbm [resolvable:$true] %s60_s10 }
   0xb   :  { %s1511_s11 = smov 64   ;;  %s1512_s12 = smov 4  }
   0xc   :  { %52 = dma.hbm_to_vmem [thread:$0]  %s45_s1, 3072, %s47_s7, [#allocation6], %s1511_s11, %s1511_s11, %s1512_s12  }
   0xd   :  { %s1513_s13 = smov [#allocation8]  }
   0xe   :  { %s62_s14 = sshll.u32 %s1513_s13, 4  ;;  %s63_s14 = int_to_ptr.vmem [resolvable:$true] %s62_s14 }
   0xf   :  { %65 = dma.hbm_to_vmem [thread:$0]  %s61_s10, 64, %s63_s14, [#allocation9]  }
  0x10   :  { %1498 = dma.done.wait [#allocation3], 512  }
  0x11   :  { %1499 = vsyncadd [#allocation3], 4294966784 }
  0x12   :  { %1500 = dma.done.wait [#allocation6], 9216  }
  0x13   :  { %1501 = vsyncadd [#allocation6], 4294958080 }
  0x14   :  { %1502 = dma.done.wait [#allocation9], 64  }
  0x15   :  { %1503 = vsyncadd [#allocation9], 4294967232  ;;  %v1019_v0 = vld [vmem:[#allocation5 + $0x70] sm:$0xf]  ;;  %v1300_v1 = vld [vmem:[#allocation5 + $0x74] sm:$0xf0]  ;;  %v86_v39 = vlaneseq }
  0x16   :  { %v1083_v2 = vld [vmem:[#allocation5 + $0xf0] sm:$0xf]  ;;  %v1020_v3 = vor.u32 %v1300_v1, %v1019_v0  ;;  %v1316_v4 = vld [vmem:[#allocation5 + $0xf4] sm:$0xf0]  ;;  %v1011_v9 = vld [vmem:[#allocation5 + $0x60] sm:$0xf] }
  0x17   :  { %v1147_v5 = vld [vmem:[#allocation5 + $0x170] sm:$0xf]  ;;  %v1332_v6 = vld [vmem:[#allocation5 + $0x174] sm:$0xf0]  ;;  %v1084_v7 = vor.u32 %v1316_v4, %v1083_v2  ;;  %v1298_v10 = vld [vmem:[#allocation5 + $0x64] sm:$0xf0] }
  0x18   :  { %v1148_v8 = vor.u32 %v1332_v6, %v1147_v5  ;;  %v1075_v11 = vld [vmem:[#allocation5 + $0xe0] sm:$0xf]  ;;  %501 = vmatpush.bf16.msra.mxu0 %v1020_v3  ;;  %v1012_v12 = vor.u32 %v1298_v10, %v1011_v9  ;;  %v1314_v13 = vld [vmem:[#allocation5 + $0xe4] sm:$0xf0]  ;;  %v1003_v18 = vld [vmem:[#allocation5 + $0x50] sm:$0xf] }
  0x19   :  { %v1139_v14 = vld [vmem:[#allocation5 + $0x160] sm:$0xf]  ;;  %v1330_v15 = vld [vmem:[#allocation5 + $0x164] sm:$0xf0]  ;;  %520 = vmatpush.bf16.msra.mxu1 %v1084_v7  ;;  %v1076_v16 = vor.u32 %v1314_v13, %v1075_v11  ;;  %v1296_v19 = vld [vmem:[#allocation5 + $0x54] sm:$0xf0] }
  0x1a   :  { %539 = vmatpush.bf16.msra.mxu2 %v1148_v8  ;;  %v1140_v17 = vor.u32 %v1330_v15, %v1139_v14  ;;  %v1067_v20 = vld [vmem:[#allocation5 + $0xd0] sm:$0xf]  ;;  %v1312_v21 = vld [vmem:[#allocation5 + $0xd4] sm:$0xf0]  ;;  %v1004_v24 = vor.u32 %v1296_v19, %v1003_v18  ;;  %v995_v27 = vld [vmem:[#allocation5 + $0x40] sm:$0xf] }
  0x1b   :  { %v1131_v22 = vld [vmem:[#allocation5 + $0x150] sm:$0xf]  ;;  %v1328_v23 = vld [vmem:[#allocation5 + $0x154] sm:$0xf0]  ;;  %v1068_v25 = vor.u32 %v1312_v21, %v1067_v20  ;;  %v1294_v28 = vld [vmem:[#allocation5 + $0x44] sm:$0xf0] }
  0x1c   :  { %502 = vmatpush.bf16.msra.mxu0 %v1012_v12  ;;  %v1132_v26 = vor.u32 %v1328_v23, %v1131_v22  ;;  %v1059_v29 = vld [vmem:[#allocation5 + $0xc0] sm:$0xf]  ;;  %v1310_v30 = vld [vmem:[#allocation5 + $0xc4] sm:$0xf0]  ;;  %v1299_v33 = vld [vmem:[#allocation5 + $0x74] sm:$0xf]  ;;  %v996_v35 = vor.u32 %v1294_v28, %v995_v27 }
  0x1d   :  { %521 = vmatpush.bf16.msra.mxu1 %v1076_v16  ;;  %v1123_v31 = vld [vmem:[#allocation5 + $0x140] sm:$0xf]  ;;  %v1326_v32 = vld [vmem:[#allocation5 + $0x144] sm:$0xf0]  ;;  %v1021_v34 = vld [vmem:[#allocation5 + $0x78] sm:$0xf0]  ;;  %v1060_v40 = vor.u32 %v1310_v30, %v1059_v29 }
  0x1e   :  { %540 = vmatpush.bf16.msra.mxu2 %v1140_v17  ;;  %v987_v36 = vld [vmem:[#allocation5 + $0x30] sm:$0xf]  ;;  %v1292_v37 = vld [vmem:[#allocation5 + $0x34] sm:$0xf0]  ;;  %v1024_v38 = vor.u32 %v1299_v33, %v1021_v34  ;;  %v1124_v41 = vor.u32 %v1326_v32, %v1123_v31  ;;  %v1297_v44 = vld [vmem:[#allocation5 + $0x64] sm:$0xf] }
  0x1f   :  { %v1051_v42 = vld [vmem:[#allocation5 + $0xb0] sm:$0xf]  ;;  %v1308_v43 = vld [vmem:[#allocation5 + $0xb4] sm:$0xf0]  ;;  %v1013_v47 = vld [vmem:[#allocation5 + $0x68] sm:$0xf0]  ;;  %v988_v49 = vor.u32 %v1292_v37, %v987_v36 }
  0x20   :  { %503 = vmatpush.bf16.msra.mxu0 %v1004_v24  ;;  %v1115_v45 = vld [vmem:[#allocation5 + $0x130] sm:$0xf]  ;;  %v1324_v46 = vld [vmem:[#allocation5 + $0x134] sm:$0xf0]  ;;  %558 = vmatpush.bf16.msra.mxu3 %v1024_v38  ;;  %v1016_v48 = vor.u32 %v1297_v44, %v1013_v47  ;;  %v1295_v50 = vld [vmem:[#allocation5 + $0x54] sm:$0xf]  ;;  %v1052_v53 = vor.u32 %v1308_v43, %v1051_v42 }
  0x21   :  { %522 = vmatpush.bf16.msra.mxu1 %v1068_v25  ;;  %v1005_v51 = vld [vmem:[#allocation5 + $0x58] sm:$0xf0]  ;;  %v1564_v52 = vshrl.u32 %v86_v39, 7  ;;  %v1116_v54 = vor.u32 %v1324_v46, %v1115_v45  ;;  %v979_v55 = vld [vmem:[#allocation5 + $0x20] sm:$0xf]  ;;  %v1566_v10 = vld [vmem:[#allocation2 + $0x8] sm:$0xff] }
  0x22   :  { %541 = vmatpush.bf16.msra.mxu2 %v1132_v26  ;;  %v1290_v56 = vld [vmem:[#allocation5 + $0x24] sm:$0xf0]  ;;  %v1043_v57 = vld [vmem:[#allocation5 + $0xa0] sm:$0xf]  ;;  %v1008_v61 = vor.u32 %v1295_v50, %v1005_v51  ;;  %v971_v62 = vld [vmem:[#allocation5 + $0x10] sm:$0xf] }
  0x23   :  { %v1306_v58 = vld [vmem:[#allocation5 + $0xa4] sm:$0xf0]  ;;  %v1107_v59 = vld [vmem:[#allocation5 + $0x120] sm:$0xf]  ;;  %v1288_v63 = vld [vmem:[#allocation5 + $0x14] sm:$0xf0]  ;;  %v980_v2 = vor.u32 %v1290_v56, %v979_v55 }
  0x24   :  { %504 = vmatpush.bf16.msra.mxu0 %v996_v35  ;;  %v1322_v60 = vld [vmem:[#allocation5 + $0x124] sm:$0xf0]  ;;  %559 = vmatpush.bf16.msra.mxu3 %v1016_v48  ;;  %v1293_v0 = vld [vmem:[#allocation5 + $0x44] sm:$0xf]  ;;  %v997_v1 = vld [vmem:[#allocation5 + $0x48] sm:$0xf0]  ;;  %v1044_v6 = vor.u32 %v1306_v58, %v1043_v57  ;;  %v972_v20 = vor.u32 %v1288_v63, %v971_v62 }
  0x25   :  { %523 = vmatpush.bf16.msra.mxu1 %v1060_v40  ;;  %v1035_v3 = vld [vmem:[#allocation5 + $0x90] sm:$0xf]  ;;  %v1304_v4 = vld [vmem:[#allocation5 + $0x94] sm:$0xf0]  ;;  %v1108_v7 = vor.u32 %v1322_v60, %v1107_v59  ;;  %v82_v9 = vld [vmem:[#allocation2] sm:$0xff]  ;;  %v95_v11 = vand.u32 15, %v1564_v52  ;;  %v1000_v15 = vor.u32 %v1293_v0, %v997_v1 }
  0x26   :  { %542 = vmatpush.bf16.msra.mxu2 %v1124_v41  ;;  %v1099_v5 = vld [vmem:[#allocation5 + $0x110] sm:$0xf]  ;;  %v1320_v8 = vld [vmem:[#allocation5 + $0x114] sm:$0xf0]  ;;  %v88_v12 = vadd.s32 8, %v1564_v52  ;;  %vm151_vm0 = vcmask 1040384   ;;  %v1036_v21 = vor.u32 %v1304_v4, %v1035_v3  ;;  %v1601_v58 = vpack.c.bf16 %v1566_v10, %v82_v9 }
  0x27   :  { %v963_v13 = vld [vmem:[#allocation5] sm:$0xf]  ;;  %v1286_v14 = vld [vmem:[#allocation5 + $0x4] sm:$0xf0]  ;;  %v1570_v16 = vld [vmem:[#allocation2 + $0x10] sm:$0xff]  ;;  %v152_v24 = vrot.slane %v82_v9, 7  ;;  %v1100_v26 = vor.u32 %v1320_v8, %v1099_v5 }
  0x28   :  { %505 = vmatpush.bf16.msra.mxu0 %v988_v49  ;;  %560 = vmatpush.bf16.msra.mxu3 %v1008_v61  ;;  %v1027_v17 = vld [vmem:[#allocation5 + $0x80] sm:$0xf]  ;;  %v1291_v18 = vld [vmem:[#allocation5 + $0x34] sm:$0xf]  ;;  %v989_v19 = vld [vmem:[#allocation5 + $0x38] sm:$0xf0]  ;;  %v964_v34 = vor.u32 %v1286_v14, %v963_v13 }
  0x29   :  { %524 = vmatpush.bf16.msra.mxu1 %v1052_v53  ;;  %v1302_v22 = vld [vmem:[#allocation5 + $0x84] sm:$0xf0]  ;;  %v1091_v23 = vld [vmem:[#allocation5 + $0x100] sm:$0xf]  ;;  %v153_v25 = vrot.slane %v1566_v10, 7  ;;  %v177_v28 = vrot.slane %v82_v9, 1  ;;  %v992_v33 = vor.u32 %v1291_v18, %v989_v19 }
  0x2a   :  { %543 = vmatpush.bf16.msra.mxu2 %v1116_v54  ;;  %v1318_v27 = vld [vmem:[#allocation5 + $0x104] sm:$0xf0]  ;;  %v178_v29 = vrot.slane %v1566_v10, 1  ;;  %v180_v30 = vrot.slane %v1570_v16, 1  ;;  %v102_v31 = vand.u32 15, %v88_v12  ;;  %vm176_vm1 = vcmask 1046528  }
  0x2b   :  { %v1315_v32 = vld [vmem:[#allocation5 + $0xf4] sm:$0xf]  ;;  %v1085_v35 = vld [vmem:[#allocation5 + $0xf8] sm:$0xf0]  ;;  %v1028_v38 = vor.u32 %v1302_v22, %v1027_v17  ;;  %v1092_v39 = vor.u32 %v1318_v27, %v1091_v23  ;;  %v154_v40 = vsel %vm151_vm0, %v152_v24, %v153_v25  ;;  %v163_v41 = vsel %vm151_vm0, 0.0, %v152_v24  ;;  %s946_s18 = sshll.u32 %s1698_s5, 4  ;;  %s947_s18 = int_to_ptr.hbm [resolvable:$true] %s946_s18 }
  0x2c   :  { %506 = vmatpush.bf16.msra.mxu0 %v980_v2  ;;  %561 = vmatpush.bf16.msra.mxu3 %v1000_v15  ;;  %v1331_v36 = vld [vmem:[#allocation5 + $0x174] sm:$0xf]  ;;  %v1149_v37 = vld [vmem:[#allocation5 + $0x178] sm:$0xf0]  ;;  %v1289_v42 = vld [vmem:[#allocation5 + $0x24] sm:$0xf]  ;;  %v179_v45 = vsel %vm176_vm1, %v177_v28, %v178_v29  ;;  %v181_v46 = vsel %vm176_vm1, %v178_v29, %v180_v30  ;;  %v1088_v48 = vor.u32 %v1315_v32, %v1085_v35 }
  0x2d   :  { %525 = vmatpush.bf16.msra.mxu1 %v1044_v6  ;;  %v981_v43 = vld [vmem:[#allocation5 + $0x28] sm:$0xf0]  ;;  %vm1579_vm2 = vcmp.ne.s32.totalorder %v95_v11, 0  ;;  %vm1587_vm3 = vcmp.ne.s32.totalorder %v102_v31, 15  ;;  %v1152_v49 = vor.u32 %v1331_v36, %v1149_v37  ;;  %v1313_v50 = vld [vmem:[#allocation5 + $0xe4] sm:$0xf]  ;;  %v1591_v51 = vpack.c.bf16 %v154_v40, %v163_v41 }
  0x2e   :  { %544 = vmatpush.bf16.msra.mxu2 %v1108_v7  ;;  %v1077_v53 = vld [vmem:[#allocation5 + $0xe8] sm:$0xf0]  ;;  %v984_v54 = vor.u32 %v1289_v42, %v981_v43  ;;  %v1329_v55 = vld [vmem:[#allocation5 + $0x164] sm:$0xf]  ;;  %vm1514_vm4 = vmmov 1   ;;  %v1603_v59 = vpack.c.bf16 %v181_v46, %v179_v45  ;;  %v85_v9 = vld [vmem:[#allocation2 + $0x18] sm:$0xff] }
  0x2f   :  { %v1141_v56 = vld [vmem:[#allocation5 + $0x168] sm:$0xf0]  ;;  %vm1596_vm5 = vmpackc.low %vm1514_vm4, %vm1579_vm2  ;;  %v1287_v60 = vld [vmem:[#allocation5 + $0x14] sm:$0xf]  ;;  %v1080_v63 = vor.u32 %v1313_v50, %v1077_v53  ;;  %v89_v11 = vadd.s32 16, %v1564_v52  ;;  %v90_v12 = vadd.s32 24, %v1564_v52 }
  0x30   :  { %507 = vmatpush.bf16.msra.mxu0 %v972_v20  ;;  %562 = vmatpush.bf16.msra.mxu3 %v992_v33  ;;  %v973_v61 = vld [vmem:[#allocation5 + $0x18] sm:$0xf0]  ;;  %vm1608_vm6 = vmpackc.low %vm1587_vm3, %vm1514_vm4  ;;  %v1144_v0 = vor.u32 %v1329_v55, %v1141_v56  ;;  %v1311_v1 = vld [vmem:[#allocation5 + $0xd4] sm:$0xf]  ;;  %v155_v20 = vrot.slane %v1570_v16, 7  ;;  %v182_v23 = vrot.slane %v85_v9, 1 }
  0x31   :  { %526 = vmatpush.bf16.msra.mxu1 %v1036_v21  ;;  %v1069_v2 = vld [vmem:[#allocation5 + $0xd8] sm:$0xf0]  ;;  %v976_v3 = vor.u32 %v1287_v60, %v973_v61  ;;  %v1327_v4 = vld [vmem:[#allocation5 + $0x154] sm:$0xf]  ;;  %v1285_v6 = vld [vmem:[#allocation5 + $0x4] sm:$0xf] }
  0x32   :  { %545 = vmatpush.bf16.msra.mxu2 %v1100_v26  ;;  %v1133_v5 = vld [vmem:[#allocation5 + $0x158] sm:$0xf0]  ;;  %v965_v7 = vld [vmem:[#allocation5 + $0x8] sm:$0xf0]  ;;  %v1309_v8 = vld [vmem:[#allocation5 + $0xc4] sm:$0xf]  ;;  %v1072_v13 = vor.u32 %v1311_v1, %v1069_v2  ;;  %v156_v32 = vsel %vm151_vm0, %v153_v25, %v155_v20 }
  0x33   :  { %v1136_v14 = vor.u32 %v1327_v4, %v1133_v5  ;;  %v1061_v15 = vld [vmem:[#allocation5 + $0xc8] sm:$0xf0]  ;;  %v968_v17 = vor.u32 %v1285_v6, %v965_v7  ;;  %v1325_v18 = vld [vmem:[#allocation5 + $0x144] sm:$0xf]  ;;  %v157_v21 = vrot.slane %v85_v9, 7  ;;  %v109_v22 = vand.u32 15, %v89_v11 }
  0x34   :  { %508 = vmatpush.bf16.msra.mxu0 %v964_v34  ;;  %563 = vmatpush.bf16.msra.mxu3 %v984_v54  ;;  %v1125_v19 = vld [vmem:[#allocation5 + $0x148] sm:$0xf0]  ;;  %v1064_v24 = vor.u32 %v1309_v8, %v1061_v15  ;;  %v116_v27 = vand.u32 15, %v90_v12  ;;  %v1307_v52 = vld [vmem:[#allocation5 + $0xb4] sm:$0xf]  ;;  %v183_v34 = vsel %vm176_vm1, %v180_v30, %v182_v23  ;;  %v188_v35 = vsel %vm176_vm1, %v182_v23, 0.0 }
  0x35   :  { %527 = vmatpush.bf16.msra.mxu1 %v1028_v38  ;;  %v1128_v26 = vor.u32 %v1325_v18, %v1125_v19  ;;  %v1053_v28 = vld [vmem:[#allocation5 + $0xb8] sm:$0xf0]  ;;  %v1323_v29 = vld [vmem:[#allocation5 + $0x134] sm:$0xf]  ;;  %v158_v33 = vsel %vm151_vm0, %v155_v20, %v157_v21  ;;  %vm141_vm7 = vcmp.ne.s32.totalorder %v109_v22, 0  ;;  %v205_v30 = vpack.c.bf16 %v85_v9, %v1570_v16  ;;  %v1346_v2 = vld [vmem:[#allocation7 + $0x68] sm:$0xff] }
  0x36   :  { %546 = vmatpush.bf16.msra.mxu2 %v1092_v39  ;;  %v1117_v31 = vld [vmem:[#allocation5 + $0x138] sm:$0xf0]  ;;  %vm146_vm8 = vcmp.ne.s32.totalorder %v116_v27, 15  ;;  %v1056_v36 = vor.u32 %v1307_v52, %v1053_v28  ;;  %v1305_v38 = vld [vmem:[#allocation5 + $0xa4] sm:$0xf]  ;;  %v1157_v39 = vpack.c.bf16 %v158_v33, %v156_v32  ;;  %vm1634_vm9 = vmpackc.low %vm1514_vm4, %vm141_vm7  ;;  %v1163_v42 = vpack.c.bf16 %v188_v35, %v183_v34 }
  0x37   :  { %1155 = vmatmul.msk.bf16.vlgmr.msra.gmra.mxu0 %vm1596_vm5, %v1591_v51  ;;  %v1120_v37 = vor.u32 %v1323_v29, %v1117_v31  ;;  %v1045_v10 = vld [vmem:[#allocation5 + $0xa8] sm:$0xf0]  ;;  %v1321_v25 = vld [vmem:[#allocation5 + $0x124] sm:$0xf]  ;;  %vm1640_vm10 = vmpackc.low %vm146_vm8, %vm1514_vm4 }
  0x38   :  { %577 = vmatpush.bf16.msrb.mxu0 %v1088_v48  ;;  %528 = vmatmul.bf16.vlgmr.msra.gmra.mxu1 %v1601_v58  ;;  %v1109_v40 = vld [vmem:[#allocation5 + $0x128] sm:$0xf0]  ;;  %v1048_v44 = vor.u32 %v1305_v38, %v1045_v10  ;;  %v1303_v46 = vld [vmem:[#allocation5 + $0x94] sm:$0xf]  ;;  %v1037_v47 = vld [vmem:[#allocation5 + $0x98] sm:$0xf0] }
  0x39   :  { %596 = vmatpush.bf16.msrb.mxu1 %v1152_v49  ;;  %1161 = vmatmul.msk.bf16.vlgmr.msra.gmra.mxu2 %vm1608_vm6, %v1603_v59  ;;  %v1112_v45 = vor.u32 %v1321_v25, %v1109_v40  ;;  %v1319_v48 = vld [vmem:[#allocation5 + $0x114] sm:$0xf]  ;;  %v1101_v49 = vld [vmem:[#allocation5 + $0x118] sm:$0xf0]  ;;  %v1040_v16 = vor.u32 %v1303_v46, %v1037_v47  ;;  %v1029_v53 = vld [vmem:[#allocation5 + $0x88] sm:$0xf0] }
  0x3a   :  { %564 = vmatpush.bf16.msra.mxu3 %v976_v3  ;;  %v1104_v50 = vor.u32 %v1319_v48, %v1101_v49  ;;  %v1317_v54 = vld [vmem:[#allocation5 + $0x104] sm:$0xf]  ;;  %v1093_v55 = vld [vmem:[#allocation5 + $0x108] sm:$0xf0]  ;;  %v1348_v61 = vld [vmem:[#allocation7 + $0x78] sm:$0xff] }
  0x3b   :  { %v1096_v60 = vor.u32 %v1317_v54, %v1093_v55  ;;  %v1339_v1 = vld [vmem:[#allocation7 + $0x30] sm:$0xff]  ;;  %v1338_v3 = vld [vmem:[#allocation7 + $0x28] sm:$0xff]  ;;  %v1345_v5 = vld [vmem:[#allocation7 + $0x60] sm:$0xff] }
  0x3c   :  { %578 = vmatpush.bf16.msrb.mxu0 %v1080_v63  ;;  %v1340_v63 = vld [vmem:[#allocation7 + $0x38] sm:$0xff]  ;;  %v1337_v7 = vld [vmem:[#allocation7 + $0x20] sm:$0xff]  ;;  %v1355_v8 = vld [vmem:[#allocation7 + $0xb0] sm:$0xff] }
  0x3d   :  { %597 = vmatpush.bf16.msrb.mxu1 %v1144_v0  ;;  %859 = vmatpush.bf16.msrb.mxu2 %v1340_v63  ;;  %v1347_v0 = vld [vmem:[#allocation7 + $0x70] sm:$0xff]  ;;  %v1344_v12 = vld [vmem:[#allocation7 + $0x58] sm:$0xff]  ;;  %v1354_v15 = vld [vmem:[#allocation7 + $0xa8] sm:$0xff] }
  0x3e   :  { %565 = vmatpush.bf16.msra.mxu3 %v968_v17  ;;  %v1343_v17 = vld [vmem:[#allocation7 + $0x50] sm:$0xff]  ;;  %v1353_v20 = vld [vmem:[#allocation7 + $0xa0] sm:$0xff]  ;;  %v1342_v23 = vld [vmem:[#allocation7 + $0x48] sm:$0xff] }
  0x3f   :  { %v1335_v19 = vld [vmem:[#allocation7 + $0x10] sm:$0xff]  ;;  %v1352_v27 = vld [vmem:[#allocation7 + $0x98] sm:$0xff]  ;;  %v1341_v52 = vld [vmem:[#allocation7 + $0x40] sm:$0xff] }
  0x40   :  { %579 = vmatpush.bf16.msrb.mxu0 %v1072_v13  ;;  %v1333_v29 = vld [vmem:[#allocation7] sm:$0xff]  ;;  %v1351_v31 = vld [vmem:[#allocation7 + $0x90] sm:$0xff]  ;;  %v1350_v35 = vld [vmem:[#allocation7 + $0x88] sm:$0xff] }
  0x41   :  { %598 = vmatpush.bf16.msrb.mxu1 %v1136_v14  ;;  %1167 = vmatmul.msk.bf16.vlgmr.msra.gmra.mxu3 %vm1596_vm5, %v1591_v51  ;;  %v1301_v51 = vld [vmem:[#allocation5 + $0x84] sm:$0xf]  ;;  %v1336_v14 = vld [vmem:[#allocation7 + $0x18] sm:$0xff] }
  0x42   :  { %v1032_v56 = vor.u32 %v1301_v51, %v1029_v53  ;;  %878 = vmatpush.bf16.msrb.mxu3 %v1348_v61  ;;  %860 = vmatpush.bf16.msrb.mxu2 %v1339_v1  ;;  %v1349_v38 = vld [vmem:[#allocation7 + $0x80] sm:$0xff] }
  0x44   :  { %580 = vmatpush.bf16.msrb.mxu0 %v1064_v24 }
  0x45   :  { %599 = vmatpush.bf16.msrb.mxu1 %v1128_v26  ;;  %v1334_v26 = vld [vmem:[#allocation7 + $0x8] sm:$0xff] }
  0x46   :  { %879 = vmatpush.bf16.msrb.mxu3 %v1347_v0  ;;  %861 = vmatpush.bf16.msrb.mxu2 %v1338_v3 }
  0x47   :  { %1158 = vmatmul.msk.bf16.gmra.mxu0 %vm1634_vm9, %v1157_v39 }
  0x48   :  { %581 = vmatpush.bf16.msrb.mxu0 %v1056_v36  ;;  %533 = vmatmul.bf16.gmra.mxu1 %v205_v30 }
  0x49   :  { %600 = vmatpush.bf16.msrb.mxu1 %v1120_v37  ;;  %1164 = vmatmul.msk.bf16.gmra.mxu2 %vm1640_vm10, %v1163_v42 }
  0x4a   :  { %880 = vmatpush.bf16.msrb.mxu3 %v1346_v2  ;;  %862 = vmatpush.bf16.msrb.mxu2 %v1337_v7 }
  0x4c   :  { %582 = vmatpush.bf16.msrb.mxu0 %v1048_v44 }
  0x4d   :  { %601 = vmatpush.bf16.msrb.mxu1 %v1112_v45 }
  0x4e   :  { %881 = vmatpush.bf16.msrb.mxu3 %v1345_v5  ;;  %863 = vmatpush.bf16.msrb.mxu2 %v1336_v14 }
  0x50   :  { %583 = vmatpush.bf16.msrb.mxu0 %v1040_v16 }
  0x51   :  { %602 = vmatpush.bf16.msrb.mxu1 %v1104_v50  ;;  %1170 = vmatmul.msk.bf16.gmra.mxu3 %vm1634_vm9, %v1157_v39 }
  0x52   :  { %882 = vmatpush.bf16.msrb.mxu3 %v1344_v12  ;;  %864 = vmatpush.bf16.msrb.mxu2 %v1335_v19 }
  0x54   :  { %584 = vmatpush.bf16.msrb.mxu0 %v1032_v56 }
  0x55   :  { %603 = vmatpush.bf16.msrb.mxu1 %v1096_v60 }
  0x56   :  { %883 = vmatpush.bf16.msrb.mxu3 %v1343_v17  ;;  %865 = vmatpush.bf16.msrb.mxu2 %v1334_v26 }
  0x57   :  { %585 = vmatmul.bf16.vlgmr.msrb.gmra.mxu0 %v1601_v58  ;;  %v255_v58 = vld [vmem:[%s1696_s3] sm:$0x3]  ;;  %s1515_s3 = smov [#allocation10]  }
  0x58   :  { %1173 = vmatmul.msk.bf16.vlgmr.msrb.gmra.mxu1 %vm1608_vm6, %v1603_v59  ;;  %v1356_v59 = vld [vmem:[#allocation7 + $0xb8] sm:$0xff]  ;;  %v257_v4 = vperm.slane %v255_v58, 0  ;;  %v258_v39 = vperm.slane %v255_v58, 1  ;;  %s944_s15 = sshll.u32 %s1515_s3, 4  ;;  %s945_s15 = int_to_ptr.vmem [resolvable:$true] %s944_s15 }
  0x59   :  { %897 = vmatpush.bf16.msra.mxu0 %v1356_v59  ;;  %1357 = vmatpush.bf16.msra.mxu1 %v1356_v59 }
  0x5a   :  { %884 = vmatpush.bf16.msrb.mxu3 %v1342_v23  ;;  %866 = vmatpush.bf16.msrb.mxu2 %v1333_v29 }
  0x5d   :  { %898 = vmatpush.bf16.msra.mxu0 %v1355_v8  ;;  %1358 = vmatpush.bf16.msra.mxu1 %v1355_v8 }
  0x5e   :  { %885 = vmatpush.bf16.msrb.mxu3 %v1341_v52 }
  0x61   :  { %899 = vmatpush.bf16.msra.mxu0 %v1354_v15  ;;  %1359 = vmatpush.bf16.msra.mxu1 %v1354_v15 }
  0x65   :  { %900 = vmatpush.bf16.msra.mxu0 %v1353_v20  ;;  %1360 = vmatpush.bf16.msra.mxu1 %v1353_v20 }
  0x67   :  { %590 = vmatmul.bf16.gmra.mxu0 %v205_v30 }
  0x68   :  { %1176 = vmatmul.msk.bf16.gmra.mxu1 %vm1640_vm10, %v1163_v42 }
  0x69   :  { %901 = vmatpush.bf16.msra.mxu0 %v1352_v27  ;;  %1361 = vmatpush.bf16.msra.mxu1 %v1352_v27 }
  0x6d   :  { %902 = vmatpush.bf16.msra.mxu0 %v1351_v31  ;;  %1362 = vmatpush.bf16.msra.mxu1 %v1351_v31 }
  0x71   :  { %903 = vmatpush.bf16.msra.mxu0 %v1350_v35  ;;  %1363 = vmatpush.bf16.msra.mxu1 %v1350_v35 }
  0x75   :  { %904 = vmatpush.bf16.msra.mxu0 %v1349_v38  ;;  %1364 = vmatpush.bf16.msra.mxu1 %v1349_v38  ;;  %v1375_v38 = vld [vmem:[#allocation8] ss:$0 sm:$0xff] }
  0xb4   :  { %v510_v6 = vpop.f32.mrf.mxu0 }
  0xb5   :  { %v511_v9 = vadd.f32 %v510_v6, %v257_v4  ;;  %v529_v11 = vpop.f32.mrf.mxu1 }
  0xb7   :  { %v1659_v13 = vadd.f32 %v529_v11, %v511_v9 }
  0xbc   :  { %v512_v18 = vpop.f32.mrf.mxu0  ;;  %v548_v62 = vpop.f32.mrf.mxu2 }
  0xbd   :  { %v513_v21 = vadd.f32 %v512_v18, %v257_v4  ;;  %v531_v22 = vpop.f32.mrf.mxu1 }
  0xbf   :  { %v1661_v24 = vadd.f32 %v531_v22, %v513_v21 }
  0xc4   :  { %v515_v28 = vpop.f32.mrf.mxu0  ;;  %v567_v36 = vpop.f32.mrf.mxu3 }
  0xc5   :  { %v516_v32 = vadd.f32 %v515_v28, %v257_v4  ;;  %v534_v33 = vpop.f32.mrf.mxu1  ;;  %v568_v30 = vadd.f32 %v567_v36, %v258_v39 }
  0xc7   :  { %v1663_v34 = vadd.f32 %v534_v33, %v516_v32  ;;  %v550_v33 = vpop.f32.mrf.mxu2 }
  0xcc   :  { %v517_v37 = vpop.f32.mrf.mxu0  ;;  %v569_v42 = vpop.f32.mrf.mxu3 }
  0xcd   :  { %v518_v10 = vadd.f32 %v517_v37, %v257_v4  ;;  %v536_v25 = vpop.f32.mrf.mxu1  ;;  %v570_v48 = vadd.f32 %v569_v42, %v258_v39 }
  0xcf   :  { %v1665_v40 = vadd.f32 %v536_v25, %v518_v10  ;;  %v553_v35 = vpop.f32.mrf.mxu2  ;;  %v549_v10 = vadd.f32 %v548_v62, %v1659_v13 }
  0xd4   :  { %v586_v44 = vpop.f32.mrf.mxu0  ;;  %v572_v53 = vpop.f32.mrf.mxu3 }
  0xd5   :  { %v587_v45 = vadd.f32 %v586_v44, %v568_v30  ;;  %v605_v46 = vpop.f32.mrf.mxu1  ;;  %v573_v56 = vadd.f32 %v572_v53, %v258_v39  ;;  %v615_v44 = vmax.f32 %v549_v10, 0.0 }
  0xd7   :  { %v606_v47 = vadd.f32 %v605_v46, %v587_v45  ;;  %v555_v36 = vpop.f32.mrf.mxu2  ;;  %v1376_v46 = vld [vmem:[#allocation8 + $0x1] ss:$0 sm:$0xff] }
  0xd9   :  { %v616_v16 = vmax.f32 %v606_v47, 0.0 }
  0xdb   :  { %v627_v55 = vrot.slane %v616_v16, 7  ;;  %v643_v8 = vrot.slane %v616_v16, 1 }
  0xdc   :  { %v588_v49 = vpop.f32.mrf.mxu0  ;;  %v574_v5 = vpop.f32.mrf.mxu3 }
  0xdd   :  { %v589_v50 = vadd.f32 %v588_v49, %v570_v48  ;;  %v607_v51 = vpop.f32.mrf.mxu1  ;;  %v638_v1 = vsel %vm151_vm0, 0.0, %v627_v55  ;;  %v575_v9 = vadd.f32 %v574_v5, %v258_v39  ;;  %v1377_v48 = vld [vmem:[#allocation8 + $0x2] ss:$0 sm:$0xff]  ;;  %v551_v49 = vadd.f32 %v550_v33, %v1661_v24 }
  0xdf   :  { %v608_v54 = vadd.f32 %v607_v51, %v589_v50 }
  0xe1   :  { %v618_v60 = vmax.f32 %v608_v54, 0.0 }
  0xe3   :  { %v628_v61 = vrot.slane %v618_v60, 7  ;;  %v660_v63 = vpack.c.bf16 %v618_v60, %v616_v16  ;;  %v644_v6 = vrot.slane %v618_v60, 1 }
  0xe4   :  { %v591_v0 = vpop.f32.mrf.mxu0 }
  0xe5   :  { %v592_v2 = vadd.f32 %v591_v0, %v573_v56  ;;  %v610_v58 = vpop.f32.mrf.mxu1  ;;  %886 = vmatmul.bf16.vlgmr.msrb.gmra.mxu3 %v660_v63  ;;  %v629_v3 = vsel %vm151_vm0, %v627_v55, %v628_v61  ;;  %v645_v14 = vsel %vm176_vm1, %v643_v8, %v644_v6  ;;  %v617_v55 = vmax.f32 %v551_v49, 0.0 }
  0xe6   :  { %v1274_v59 = vpack.c.bf16 %v629_v3, %v638_v1  ;;  %v554_v0 = vadd.f32 %v553_v35, %v1663_v34  ;;  %v556_v8 = vadd.f32 %v555_v36, %v1665_v40 }
  0xe7   :  { %v611_v4 = vadd.f32 %v610_v58, %v592_v2 }
  0xe8   :  { %1275 = vmatmul.msk.bf16.vlgmr.msrb.gmra.mxu2 %vm1596_vm5, %v1274_v59  ;;  %v619_v24 = vmax.f32 %v554_v0, 0.0  ;;  %v621_v34 = vmax.f32 %v556_v8, 0.0 }
  0xe9   :  { %v620_v7 = vmax.f32 %v611_v4, 0.0 }
  0xeb   :  { %v646_v11 = vrot.slane %v620_v7, 1  ;;  %v630_v21 = vrot.slane %v620_v7, 7 }
  0xec   :  { %v593_v12 = vpop.f32.mrf.mxu0 }
  0xed   :  { %v647_v15 = vsel %vm176_vm1, %v644_v6, %v646_v11  ;;  %v594_v17 = vadd.f32 %v593_v12, %v575_v9  ;;  %v612_v19 = vpop.f32.mrf.mxu1  ;;  %v631_v28 = vsel %vm151_vm0, %v628_v61, %v630_v21 }
  0xee   :  { %v1280_v18 = vpack.c.bf16 %v647_v15, %v645_v14 }
  0xef   :  { %v613_v20 = vadd.f32 %v612_v19, %v594_v17 }
  0xf0   :  { %1281 = vmatmul.msk.bf16.vlgmr.msra.gmra.mxu0 %vm1608_vm6, %v1280_v18 }
  0xf1   :  { %v622_v57 = vmax.f32 %v613_v20, 0.0 }
  0xf3   :  { %v632_v22 = vrot.slane %v622_v57, 7  ;;  %v648_v23 = vrot.slane %v622_v57, 1  ;;  %v663_v26 = vpack.c.bf16 %v622_v57, %v620_v7 }
  0xf5   :  { %v649_v27 = vsel %vm176_vm1, %v646_v11, %v648_v23  ;;  %v654_v52 = vsel %vm176_vm1, %v648_v23, 0.0  ;;  %891 = vmatmul.bf16.gmra.mxu3 %v663_v26  ;;  %v633_v29 = vsel %vm151_vm0, %v630_v21, %v632_v22 }
  0xf6   :  { %v1283_v31 = vpack.c.bf16 %v654_v52, %v649_v27  ;;  %v1277_v32 = vpack.c.bf16 %v633_v29, %v631_v28 }
  0xf8   :  { %1278 = vmatmul.msk.bf16.gmra.mxu2 %vm1634_vm9, %v1277_v32  ;;  %1284 = vmatmul.msk.bf16.vlgmr.msra.gmra.mxu1 %vm1640_vm10, %v1283_v31 }
 0x168   :  { %v887_v37 = vpop.f32.mrf.mxu3 }
 0x16b   :  { %v868_v39 = vpop.f32.mrf.mxu2 }
 0x16c   :  { %v869_v25 = vadd.f32 %v1375_v38, %v868_v39 }
 0x16d   :  { %v906_v30 = vpop.f32.mrf.mxu0 }
 0x16e   :  { %v888_v42 = vadd.f32 %v887_v37, %v869_v25 }
 0x170   :  { %v907_v45 = vadd.f32 %v906_v30, %v888_v42  ;;  %v889_v41 = vpop.f32.mrf.mxu3 }
 0x172   :  { %v916_v47 = vadd.f32 %v907_v45, %v615_v44 }
 0x173   :  { %v870_v43 = vpop.f32.mrf.mxu2 }
 0x174   :  { %v922_v16 = vmul.f32 %v1376_v46, %v916_v47  ;;  %v871_v50 = vadd.f32 %v1375_v38, %v870_v43 }
 0x175   :  { %v908_v54 = vpop.f32.mrf.mxu0  ;;  %v911_v58 = vpop.f32.mrf.mxu1 }
 0x176   :  { %v928_v51 = vadd.f32 %v1377_v48, %v922_v16  ;;  %v890_v53 = vadd.f32 %v889_v41, %v871_v50 }
 0x178   :  { %v932_v56 = vmax.f32 %v928_v51, 0.0  ;;  %v909_v13 = vadd.f32 %v908_v54, %v890_v53  ;;  %v892_v61 = vpop.f32.mrf.mxu3 }
 0x17a   :  { %936 = vst [vmem:[#allocation10] sm:$0xff] %v932_v56  ;;  %v917_v60 = vadd.f32 %v909_v13, %v617_v55 }
 0x17b   :  { %v873_v63 = vpop.f32.mrf.mxu2 }
 0x17c   :  { %v923_v1 = vmul.f32 %v1376_v46, %v917_v60  ;;  %v874_v2 = vadd.f32 %v1375_v38, %v873_v63 }
 0x17d   :  { %v913_v17 = vpop.f32.mrf.mxu1 }
 0x17e   :  { %v929_v3 = vadd.f32 %v1377_v48, %v923_v1  ;;  %v893_v59 = vadd.f32 %v892_v61, %v874_v2 }
 0x180   :  { %v933_v4 = vmax.f32 %v929_v3, 0.0  ;;  %v912_v5 = vadd.f32 %v911_v58, %v893_v59  ;;  %v894_v12 = vpop.f32.mrf.mxu3 }
 0x182   :  { %937 = vst [vmem:[#allocation10 + $0x8] sm:$0xff] %v933_v4  ;;  %v918_v6 = vadd.f32 %v912_v5, %v619_v24 }
 0x183   :  { %v875_v7 = vpop.f32.mrf.mxu2 }
 0x184   :  { %v924_v9 = vmul.f32 %v1376_v46, %v918_v6  ;;  %v876_v11 = vadd.f32 %v1375_v38, %v875_v7 }
 0x186   :  { %v930_v14 = vadd.f32 %v1377_v48, %v924_v9  ;;  %v895_v15 = vadd.f32 %v894_v12, %v876_v11 }
 0x188   :  { %v934_v18 = vmax.f32 %v930_v14, 0.0  ;;  %v914_v19 = vadd.f32 %v913_v17, %v895_v15 }
 0x18a   :  { %938 = vst [vmem:[#allocation10 + $0x10] sm:$0xff] %v934_v18  ;;  %v919_v20 = vadd.f32 %v914_v19, %v621_v34 }
 0x18c   :  { %v925_v21 = vmul.f32 %v1376_v46, %v919_v20 }
 0x18e   :  { %v931_v57 = vadd.f32 %v1377_v48, %v925_v21 }
 0x190   :  { %v935_v40 = vmax.f32 %v931_v57, 0.0 }
 0x192   :  { %939 = vst [vmem:[#allocation10 + $0x18] sm:$0xff] %v935_v40 }
 0x193   :  { %952 = dma.vmem_to_hbm [thread:$0]  %s945_s15, 512, %s947_s18, [#allocation4], %s1507_s26, %s1507_s26, %s1508_s27  }
 0x194   :  { %1504 = dma.done.wait [#allocation4], 512  }
 0x195   :  { %1505 = vsyncadd [#allocation4], 4294966784 }
 0x196   :  { %957 = vsyncpa [#allocation3], 1 }
 0x197   :  { %958 = vsyncpa [#allocation6], 1 }
 0x198   :  { %959 = vsyncpa [#allocation9], 1 }
 0x199   :  { %960 = vsyncpa [#allocation4], 1 }

</bundles_post_ra>
